<compile_context>
chip_gen: v6e
topology: v6e:2x2x1
jax: 0.10.0
libtpu: 0.0.40
codegen_flags: <defaults>
</compile_context>

<pallas_src>
import math

import jax
import jax.numpy as jnp
from jax import lax
from jax.experimental import pallas as pl
from jax.experimental.pallas import tpu as pltpu


# ----------------------------------------------------------------------------
# helpers
# ----------------------------------------------------------------------------
def _pick_tile(dim, candidates):
    """Largest candidate tile that divides `dim`; fall back to the full dim."""
    for c in candidates:
        if c <= dim and dim % c == 0:
            return c
    return dim


# ----------------------------------------------------------------------------
# Kernel 1: tiled dense linear  y = x @ W + b
# ----------------------------------------------------------------------------
def _linear_kernel(x_ref, w_ref, b_ref, o_ref, acc_ref):
    k = pl.program_id(2)

    @pl.when(k == 0)
    def _():
        acc_ref[...] = jnp.zeros(acc_ref.shape, jnp.float32)

    acc_ref[...] += jnp.dot(x_ref[...], w_ref[...],
                            preferred_element_type=jnp.float32)

    @pl.when(k == pl.num_programs(2) - 1)
    def _():
        o_ref[...] = (acc_ref[...] + b_ref[...].astype(jnp.float32)
                      ).astype(o_ref.dtype)


def linear(x, w, b):
    """x: (M, K), w: (K, N), b: (N,) -> (M, N), tiled over all three dims."""
    m, kdim = x.shape
    n = w.shape[1]
    tm = _pick_tile(m, (512, 256, 128, 64, 32, 16, 8))
    tn = _pick_tile(n, (512, 256, 128))
    tk = _pick_tile(kdim, (512, 256, 128))
    grid = (m // tm, n // tn, kdim // tk)
    return pl.pallas_call(
        _linear_kernel,
        out_shape=jax.ShapeDtypeStruct((m, n), x.dtype),
        grid=grid,
        in_specs=[
            pl.BlockSpec((tm, tk), lambda i, j, k: (i, k)),
            pl.BlockSpec((tk, tn), lambda i, j, k: (k, j)),
            pl.BlockSpec((1, tn), lambda i, j, k: (0, j)),
        ],
        out_specs=pl.BlockSpec((tm, tn), lambda i, j, k: (i, j)),
        scratch_shapes=[pltpu.VMEM((tm, tn), jnp.float32)],
        compiler_params=pltpu.CompilerParams(
            dimension_semantics=("parallel", "parallel", "arbitrary")),
    )(x, w, b.reshape(1, n))


# ----------------------------------------------------------------------------
# Kernel 2: flash-style multi-head attention on (B, L, H*dh) layout
# ----------------------------------------------------------------------------
def _make_flash_kernel(num_heads, dim_per_head):
    H, dh = num_heads, dim_per_head

    def kernel(q_ref, k_ref, v_ref, o_ref, m_scr, l_scr, acc_scr):
        ki = pl.program_id(2)

        @pl.when(ki == 0)
        def _():
            m_scr[...] = jnp.full(m_scr.shape, -jnp.inf, jnp.float32)
            l_scr[...] = jnp.zeros(l_scr.shape, jnp.float32)
            acc_scr[...] = jnp.zeros(acc_scr.shape, jnp.float32)

        # static unroll over heads (H is small); heads are lane slabs of width dh
        for h in range(H):
            lo = h * dh
            hi = lo + dh
            qh = q_ref[0, :, lo:hi]          # (tq, dh)   (scale pre-folded in wq)
            kh = k_ref[0, :, lo:hi]          # (tk, dh)
            vh = v_ref[0, :, lo:hi]          # (tk, dh)

            # scores = qh @ kh^T : contract last dims, no explicit transpose
            s = lax.dot_general(qh, kh, (((1,), (1,)), ((), ())),
                                preferred_element_type=jnp.float32)   # (tq, tk)

            m_prev = m_scr[h]                                         # (tq, 1)
            m_new = jnp.maximum(m_prev, jnp.max(s, axis=-1, keepdims=True))
            alpha = jnp.exp(m_prev - m_new)
            p = jnp.exp(s - m_new)
            l_scr[h] = alpha * l_scr[h] + jnp.sum(p, axis=-1, keepdims=True)
            pv = jnp.dot(p.astype(vh.dtype), vh,
                         preferred_element_type=jnp.float32)          # (tq, dh)
            acc_scr[:, lo:hi] = alpha * acc_scr[:, lo:hi] + pv
            m_scr[h] = m_new

        @pl.when(ki == pl.num_programs(2) - 1)
        def _():
            # normalize after PV matmul (Lq*dh elems, EUP reciprocal), then one
            # lane-dense (tq, H*dh) store of the output block.
            for h in range(H):
                lo = h * dh
                hi = lo + dh
                inv = pl.reciprocal(l_scr[h], approx=True)
                acc_scr[:, lo:hi] = acc_scr[:, lo:hi] * inv
            o_ref[0] = acc_scr[...].astype(o_ref.dtype)

    return kernel


def flash_attention(q, k, v, head_count, dim_per_head):
    """q: (B, Lq, D), k/v: (B, Lk, D) with D = H*dh -> context (B, Lq, D)."""
    B, Lq, D = q.shape
    Lk = k.shape[1]
    tq = _pick_tile(Lq, (256, 128, 64, 32, 16, 8))
    tk = _pick_tile(Lk, (256, 128, 64, 32, 16, 8))
    grid = (B, Lq // tq, Lk // tk)
    return pl.pallas_call(
        _make_flash_kernel(head_count, dim_per_head),
        out_shape=jax.ShapeDtypeStruct((B, Lq, D), q.dtype),
        grid=grid,
        in_specs=[
            pl.BlockSpec((1, tq, D), lambda b, qi, ki: (b, qi, 0)),
            pl.BlockSpec((1, tk, D), lambda b, qi, ki: (b, ki, 0)),
            pl.BlockSpec((1, tk, D), lambda b, qi, ki: (b, ki, 0)),
        ],
        out_specs=pl.BlockSpec((1, tq, D), lambda b, qi, ki: (b, qi, 0)),
        scratch_shapes=[
            pltpu.VMEM((head_count, tq, 1), jnp.float32),   # running max m
            pltpu.VMEM((head_count, tq, 1), jnp.float32),   # running sum l
            pltpu.VMEM((tq, D), jnp.float32),               # context accumulator
        ],
        compiler_params=pltpu.CompilerParams(
            dimension_semantics=("parallel", "parallel", "arbitrary")),
    )(q, k, v)


# ----------------------------------------------------------------------------
# Module wrapper
# ----------------------------------------------------------------------------
class MultiHeadedAttentionPallas:
    def __init__(self, head_count, model_dim, key, dropout=0.1,
                 use_final_linear=True, dtype=jnp.float32):
        assert model_dim % head_count == 0
        self.head_count = head_count
        self.model_dim = model_dim
        self.dim_per_head = model_dim // head_count
        self.use_final_linear = use_final_linear

        ks = jax.random.split(key, 8)
        bound = 1.0 / math.sqrt(model_dim)   # nn.Linear default init range

        def mk_w(k):  # stored as (in, out) == W.T of the PyTorch weight
            return jax.random.uniform(k, (model_dim, model_dim), dtype,
                                      -bound, bound)

        def mk_b(k):
            return jax.random.uniform(k, (model_dim,), dtype, -bound, bound)

        self.wk, self.bk = mk_w(ks[0]), mk_b(ks[1])
        self.wv, self.bv = mk_w(ks[2]), mk_b(ks[3])
        self.wq, self.bq = mk_w(ks[4]), mk_b(ks[5])
        if use_final_linear:
            self.wo, self.bo = mk_w(ks[6]), mk_b(ks[7])

        # fold 1/sqrt(dh) into the query projection once at init
        scale = 1.0 / math.sqrt(self.dim_per_head)
        self.wq_s = (self.wq * scale).astype(dtype)
        self.bq_s = (self.bq * scale).astype(dtype)
        # fused QKV projection weights for the self-attention case
        self.w_qkv = jnp.concatenate([self.wq_s, self.wk, self.wv], axis=1)
        self.b_qkv = jnp.concatenate([self.bq_s, self.bk, self.bv])

    def __call__(self, key, value, query, mask=None, layer_cache=None,
                 type=None, predefined_graph_1=None):
        # TODO(synk): mask / layer_cache / predefined_graph_1 branches not
        # implemented; dropout is identity in eval mode.
        if mask is not None or layer_cache is not None or predefined_graph_1 is not None:
            raise NotImplementedError(
                "mask / layer_cache / predefined_graph_1 not implemented")

        B, Lk, D = key.shape
        Lq = query.shape[1]
        H, dh = self.head_count, self.dim_per_head

        if (key is value) and (key is query):
            # self-attention: one fused QKV projection (single pallas_call)
            qkv = linear(query.reshape(B * Lq, D), self.w_qkv, self.b_qkv)
            q_p, k_p, v_p = jnp.split(qkv, 3, axis=-1)
        else:
            q_p = linear(query.reshape(B * Lq, D), self.wq_s, self.bq_s)
            k_p = linear(key.reshape(B * Lk, D), self.wk, self.bk)
            v_p = linear(value.reshape(B * Lk, D), self.wv, self.bv)

        # No host-side head transposes: heads stay packed in the last dim and
        # are addressed as lane slabs inside the attention kernel.
        qh = q_p.reshape(B, Lq, D)
        kh = k_p.reshape(B, Lk, D)
        vh = v_p.reshape(B, Lk, D)

        ctx = flash_attention(qh, kh, vh, H, dh)          # (B, Lq, D)

        if self.use_final_linear:
            out = linear(ctx.reshape(B * Lq, D), self.wo, self.bo)
            return out.reshape(B, Lq, D)
        # PyTorch returns the un-merged (B, H, Lq, dh) context on this path.
        return ctx.reshape(B, Lq, H, dh).transpose(0, 2, 1, 3)


# ----------------------------------------------------------------------------
# Pure-JAX reference for verification (mirrors the PyTorch forward)
# ----------------------------------------------------------------------------
def reference_forward(mod, key, value, query):
    B, Lk, D = key.shape
    Lq = query.shape[1]
    H, dh = mod.head_count, mod.dim_per_head
    k_p = key.reshape(B * Lk, D) @ mod.wk + mod.bk
    v_p = value.reshape(B * Lk, D) @ mod.wv + mod.bv
    q_p = query.reshape(B * Lq, D) @ mod.wq + mod.bq
    kh = k_p.reshape(B, Lk, H, dh).transpose(0, 2, 1, 3)
    vh = v_p.reshape(B, Lk, H, dh).transpose(0, 2, 1, 3)
    qh = q_p.reshape(B, Lq, H, dh).transpose(0, 2, 1, 3) / math.sqrt(dh)
    scores = jnp.einsum("bhqd,bhkd->bhqk", qh, kh)
    attn = jax.nn.softmax(scores, axis=-1)
    ctx = jnp.einsum("bhqk,bhkd->bhqd", attn, vh)
    ctx = ctx.transpose(0, 2, 1, 3).reshape(B, Lq, D)
    if mod.use_final_linear:
        return (ctx.reshape(B * Lq, D) @ mod.wo + mod.bo).reshape(B, Lq, D)
    return ctx.reshape(B, Lq, H, dh).transpose(0, 2, 1, 3)


if __name__ == "__main__":
    rng = jax.random.PRNGKey(0)
    k_param, k_key, k_val, k_qry, k_self = jax.random.split(rng, 5)

    batch, seq, model_dim, heads = 2, 8, 32, 4
    mod = MultiHeadedAttentionPallas(heads, model_dim, k_param)

    key_in = jax.random.normal(k_key, (batch, seq, model_dim), jnp.float32)
    value_in = jax.random.normal(k_val, (batch, seq, model_dim), jnp.float32)
    query_in = jax.random.normal(k_qry, (batch, seq, model_dim), jnp.float32)

    # general path: three separate tiled projections
    out = jax.block_until_ready(mod(key_in, value_in, query_in))
    ref = reference_forward(mod, key_in, value_in, query_in)
    assert out.shape == (batch, seq, model_dim)
    assert jnp.allclose(out, ref, atol=2e-2, rtol=2e-2), "mismatch (general path)"

    # self-attention path: fused QKV projection in a single pallas_call
    x_in = jax.random.normal(k_self, (batch, seq, model_dim), jnp.float32)
    out_self = jax.block_until_ready(mod(x_in, x_in, x_in))
    ref_self = reference_forward(mod, x_in, x_in, x_in)
    assert jnp.allclose(out_self, ref_self, atol=2e-2, rtol=2e-2), \
        "mismatch (fused self-attention path)"

    print("KERNEL_OK")
</pallas_src>

<mosaic_0001>
module attributes {stable_mosaic.version = 11 : i64} {
  func.func @_linear_kernel(%arg0: i32, %arg1: i32, %arg2: i32, %arg3: memref<16x32xf32, #tpu.memory_space<vmem>>, %arg4: memref<32x32xf32, #tpu.memory_space<vmem>>, %arg5: memref<1x32xf32, #tpu.memory_space<vmem>>, %arg6: memref<16x32xf32, #tpu.memory_space<vmem>>, %arg7: memref<16x32xf32, #tpu.memory_space<vmem>>) attributes {dimension_semantics = [#tpu.dimension_semantics<parallel>, #tpu.dimension_semantics<parallel>, #tpu.dimension_semantics<arbitrary>], iteration_bounds = array<i64: 1, 1, 1>, scalar_prefetch = 0 : i64, scratch_operands = 1 : i64, tpu.core_type = #tpu.core_type<tc>, window_params = [{transform_indices = @transform_0, window_bounds = array<i64: 16, 32>}, {transform_indices = @transform_1, window_bounds = array<i64: 32, 32>}, {transform_indices = @transform_2, window_bounds = array<i64: 1, 32>}, {transform_indices = @transform_3, window_bounds = array<i64: 16, 32>}]} {
    %c0_i32 = arith.constant 0 : i32
    %0 = arith.cmpi eq, %arg2, %c0_i32 : i32
    %1 = arith.extui %0 : i1 to i32
    %c0_i32_0 = arith.constant 0 : i32
    %2 = arith.cmpi ne, %1, %c0_i32_0 : i32
    scf.if %2 {
      %cst_10 = arith.constant 0.000000e+00 : f32
      %12 = vector.broadcast %cst_10 : f32 to vector<16x32xf32>
      %c0_11 = arith.constant 0 : index
      %c0_12 = arith.constant 0 : index
      %13 = vector.load %arg7[%c0_11, %c0_12] : memref<16x32xf32, #tpu.memory_space<vmem>>, vector<16x32xf32>
      tpu.vector_store %arg7[%c0_11, %c0_12], %12 {strides = array<i32>} : memref<16x32xf32, #tpu.memory_space<vmem>>, vector<16x32xf32>,
    } else {
    }
    %c0 = arith.constant 0 : index
    %c0_1 = arith.constant 0 : index
    %3 = vector.load %arg7[%c0, %c0_1] : memref<16x32xf32, #tpu.memory_space<vmem>>, vector<16x32xf32>
    %c0_2 = arith.constant 0 : index
    %c0_3 = arith.constant 0 : index
    %4 = vector.load %arg3[%c0_2, %c0_3] : memref<16x32xf32, #tpu.memory_space<vmem>>, vector<16x32xf32>
    %c0_4 = arith.constant 0 : index
    %c0_5 = arith.constant 0 : index
    %5 = vector.load %arg4[%c0_4, %c0_5] : memref<32x32xf32, #tpu.memory_space<vmem>>, vector<32x32xf32>
    %cst = arith.constant dense<0.000000e+00> : vector<16x32xf32>
    %6 = tpu.matmul %4, %5, %cst {dimension_numbers = #tpu.dot_dimension_numbers<[1], [0], [0], [1], [0, 0, 1, 1], [], []>} : vector<16x32xf32>, vector<32x32xf32>, vector<16x32xf32> -> vector<16x32xf32>
    %7 = arith.addf %3, %6 : vector<16x32xf32>
    %c0_6 = arith.constant 0 : index
    %c0_7 = arith.constant 0 : index
    %8 = vector.load %arg7[%c0_6, %c0_7] : memref<16x32xf32, #tpu.memory_space<vmem>>, vector<16x32xf32>
    tpu.vector_store %arg7[%c0_6, %c0_7], %7 {strides = array<i32>} : memref<16x32xf32, #tpu.memory_space<vmem>>, vector<16x32xf32>,
    %c0_i32_8 = arith.constant 0 : i32
    %9 = arith.cmpi eq, %arg2, %c0_i32_8 : i32
    %10 = arith.extui %9 : i1 to i32
    %c0_i32_9 = arith.constant 0 : i32
    %11 = arith.cmpi ne, %10, %c0_i32_9 : i32
    scf.if %11 {
      %c0_10 = arith.constant 0 : index
      %c0_11 = arith.constant 0 : index
      %12 = vector.load %arg7[%c0_10, %c0_11] : memref<16x32xf32, #tpu.memory_space<vmem>>, vector<16x32xf32>
      %c0_12 = arith.constant 0 : index
      %c0_13 = arith.constant 0 : index
      %13 = vector.load %arg5[%c0_12, %c0_13] : memref<1x32xf32, #tpu.memory_space<vmem>>, vector<1x32xf32>
      %14 = vector.broadcast %13 : vector<1x32xf32> to vector<16x32xf32>
      %15 = arith.addf %12, %14 : vector<16x32xf32>
      %c0_14 = arith.constant 0 : index
      %c0_15 = arith.constant 0 : index
      %16 = vector.load %arg6[%c0_14, %c0_15] : memref<16x32xf32, #tpu.memory_space<vmem>>, vector<16x32xf32>
      tpu.vector_store %arg6[%c0_14, %c0_15], %15 {strides = array<i32>} : memref<16x32xf32, #tpu.memory_space<vmem>>, vector<16x32xf32>,
    } else {
    }
    return
  }
  func.func @transform_0(%arg0: i32, %arg1: i32, %arg2: i32) -> (i32, i32) {
    %c0_i32 = arith.constant 0 : i32
    return %arg0, %arg2 : i32, i32
  }
  func.func @transform_1(%arg0: i32, %arg1: i32, %arg2: i32) -> (i32, i32) {
    %c0_i32 = arith.constant 0 : i32
    return %arg2, %arg1 : i32, i32
  }
  func.func @transform_2(%arg0: i32, %arg1: i32, %arg2: i32) -> (i32, i32) {
    %c0_i32 = arith.constant 0 : i32
    %c0_i32_0 = arith.constant 0 : i32
    return %c0_i32, %arg1 : i32, i32
  }
  func.func @transform_3(%arg0: i32, %arg1: i32, %arg2: i32) -> (i32, i32) {
    %c0_i32 = arith.constant 0 : i32
    return %arg0, %arg1 : i32, i32
  }
}

</mosaic_0001>

<bundles_post_ra>
// kernel: tpu_custom_call.1
= control target key start
LH: loop header
LB: loop body
LE: loop exit
PB: predicated region body
PF: predicated region fallthrough
CT: control target
= control target key end

     0   :  { %8 = vsyncpa [#allocation4], 0  ;;  %s325_s0 = inlined_call_operand.hbm [shape: f32[16,32], index: 0, kind: input, shape index: {}]   ;;  %s326_s1 = inlined_call_operand.hbm [shape: f32[32,32], index: 1, kind: input, shape index: {}]   ;;  %s327_s2 = inlined_call_operand.vmem [shape: f32[1,32], index: 2, kind: input, shape index: {}]   ;;  %s328_s3 = inlined_call_operand.hbm [shape: f32[16,32], index: 3, kind: output, shape index: {}]  }
   0x1   :  { %9 = vsyncpa [#allocation7], 0 }
   0x2   :  { %10 = vsyncpa [#allocation5], 0  ;;  %s270_s12 = smov [#allocation3]  }
   0x3   :  { %s16_s13 = sshll.u32 %s270_s12, 4  ;;  %s17_s13 = int_to_ptr.vmem [resolvable:$true] %s16_s13 }
   0x4   :  { %s212_s14 = scalar_lea.vmem %s17_s13, 256  ;;  %p217_p1 = scmp.lt.s32.totalorder %s17_s13, %s17_s13 }
   0x5   :  { %p213_p0 = scmp.ne.s32.totalorder %s17_s13, %s212_s14  ;;  %p218_p2 = scmp.lt.s32.totalorder %s212_s14, %s212_s14 }
   0x7   :  { %p219_p3 = por %p218_p2, %p217_p1 }
   0x9   :  { %p220_p4 = pnand %p219_p3, %p213_p0 }
   0xb   :  { %223 = shalt.err (!%p220_p4)
}
   0xc   :  { %s271_s15 = smov 128   ;;  %s272_s16 = smov 8  }
   0xd   :  { %22 = dma.hbm_to_vmem [thread:$0]  %s325_s0, 256, %s17_s13, [#allocation4], %s271_s15, %s271_s15, %s272_s16  }
   0xe   :  { %s273_s19 = smov [#allocation6]  }
   0xf   :  { %s28_s20 = sshll.u32 %s273_s19, 4  ;;  %s29_s20 = int_to_ptr.vmem [resolvable:$true] %s28_s20 }
  0x10   :  { %s232_s21 = scalar_lea.vmem %s29_s20, 512  ;;  %p237_p6 = scmp.lt.s32.totalorder %s29_s20, %s29_s20 }
  0x11   :  { %p233_p5 = scmp.ne.s32.totalorder %s29_s20, %s232_s21  ;;  %p238_p7 = scmp.lt.s32.totalorder %s232_s21, %s232_s21 }
  0x13   :  { %p239_p8 = por %p238_p7, %p237_p6 }
  0x15   :  { %p240_p9 = pnand %p239_p8, %p233_p5 }
  0x17   :  { %243 = shalt.err (!%p240_p9)
}
  0x18   :  { %34 = dma.hbm_to_vmem [thread:$0]  %s326_s1, 512, %s29_s20, [#allocation7], %s271_s15, %s271_s15, %s272_s16  }
  0x19   :  { %264 = dma.done.wait [#allocation4], 256  }
  0x1a   :  { %265 = vsyncadd [#allocation4], 4294967040 }
  0x1b   :  { %266 = dma.done.wait [#allocation7], 512  }
  0x1c   :  { %267 = vsyncadd [#allocation7], 4294966784  ;;  %vm47_vm0 = vcmask 261120   ;;  %v274_v0 = vmov 0.0   ;;  %v57_v1 = vld [vmem:[#allocation6 + $0x18] sm:$0xff]  ;;  %v56_v2 = vld [vmem:[#allocation6 + $0x10] sm:$0xff] }
  0x1d   :  { %49 = vst.msk [vmem:[#allocation2 + $0x8] sm:$0xff] %vm47_vm0, %v274_v0  ;;  %48 = vst.msk [vmem:[#allocation2] sm:$0xff] %vm47_vm0, %v274_v0  ;;  %187 = vmatprep.subr.mxu0 %v57_v1  ;;  %v52_v3 = vld [vmem:[#allocation3] sm:$0xff]  ;;  %v55_v4 = vld [vmem:[#allocation6 + $0x8] sm:$0xff]  ;;  %s275_s24 = smov [#allocation8]  }
  0x1e   :  { %188 = vmatpush3.msra.mxu0 %v57_v1  ;;  %195 = vmatprep.mubr.msk.f32.mxu0 %vm47_vm0, %v52_v3  ;;  %v54_v5 = vld [vmem:[#allocation6] sm:$0xff]  ;;  %v53_v6 = vld [vmem:[#allocation3 + $0x8] sm:$0xff]  ;;  %s165_s25 = sshll.u32 %s275_s24, 4  ;;  %s166_s25 = int_to_ptr.vmem [resolvable:$true] %s165_s25 }
  0x1f   :  { %189 = vmatprep.subr.mxu0 %v56_v2  ;;  %v180_v13 = vld [vmem:[%s327_s2] ss:$0 sm:$0xff]  ;;  %s244_s26 = scalar_lea.vmem %s166_s25, 256  ;;  %p249_p11 = scmp.lt.s32.totalorder %s166_s25, %s166_s25 }
  0x20   :  { %190 = vmatpush3.msra.mxu0 %v56_v2  ;;  %p245_p10 = scmp.ne.s32.totalorder %s166_s25, %s244_s26  ;;  %p250_p12 = scmp.lt.s32.totalorder %s244_s26, %s244_s26 }
  0x21   :  { %191 = vmatprep.subr.mxu0 %v55_v4 }
  0x22   :  { %192 = vmatpush3.msra.mxu0 %v55_v4  ;;  %p251_p13 = por %p250_p12, %p249_p11 }
  0x23   :  { %193 = vmatprep.subr.mxu0 %v54_v5 }
  0x24   :  { %194 = vmatpush3.msra.mxu0 %v54_v5  ;;  %v51_v7 = vld [vmem:[#allocation2 + $0x8] sm:$0xff]  ;;  %v50_v9 = vld [vmem:[#allocation2] sm:$0xff]  ;;  %p252_p0 = pnand %p251_p13, %p245_p10 }
  0x25   :  { %196 = vmatmul.mubr.msk.f32.vlgmr.msra.gmra.mxu0 %vm47_vm0, %v53_v6 }
  0xe5   :  { %v197_v8 = vpop.f32.mrf.mxu0 }
  0xe6   :  { %v141_v10 = vadd.f32 %v197_v8, %v51_v7 }
  0xe7   :  { %v131_v11 = vpop.f32.mrf.mxu0 }
  0xe8   :  { %143 = vst.msk [vmem:[#allocation2 + $0x8] sm:$0xff] %vm47_vm0, %v141_v10  ;;  %v140_v12 = vadd.f32 %v131_v11, %v50_v9 }
  0xea   :  { %142 = vst.msk [vmem:[#allocation2] sm:$0xff] %vm47_vm0, %v140_v12 }
  0xef   :  { %v148_v14 = vld [vmem:[#allocation2 + $0x8] sm:$0xff] }
  0xf0   :  { %v157_v15 = vadd.f32 %v180_v13, %v148_v14 }
  0xf1   :  { %v147_v16 = vld [vmem:[#allocation2] sm:$0xff] }
  0xf2   :  { %v156_v17 = vadd.f32 %v180_v13, %v147_v16  ;;  %159 = vst.msk [vmem:[#allocation8 + $0x8] sm:$0xff] %vm47_vm0, %v157_v15 }
  0xf4   :  { %158 = vst.msk [vmem:[#allocation8] sm:$0xff] %vm47_vm0, %v156_v17 }
  0xf5   :  { %255 = shalt.err (!%p252_p0)
}
  0xf6   :  { %171 = dma.vmem_to_hbm [thread:$0]  %s166_s25, 256, %s328_s3, [#allocation5], %s271_s15, %s271_s15, %s272_s16  }
  0xf7   :  { %268 = dma.done.wait [#allocation5], 256  }
  0xf8   :  { %269 = vsyncadd [#allocation5], 4294967040 }
  0xf9   :  { %175 = vsyncpa [#allocation4], 1 }
  0xfa   :  { %176 = vsyncpa [#allocation7], 1 }
  0xfb   :  { %177 = vsyncpa [#allocation5], 1 }

</bundles_post_ra>
